<compile_context>
chip_gen: v6e
topology: v6e:2x2x1
jax: 0.10.0
libtpu: 0.0.40
codegen_flags: <defaults>
</compile_context>

<pallas_src>
import functools

import jax
import jax.numpy as jnp
from jax.experimental import pallas as pl
from jax.experimental.pallas import tpu as pltpu


def _round_up(x, m):
    return ((x + m - 1) // m) * m


def qmix_mixer_kernel(q_ref, s_ref, w1_ref, b1_ref, w2_ref, b2_ref,
                      wv2_ref, bv2_ref, out_ref, *,
                      num_agents, embed_dim, hypernet_embed):
    A, E, H = num_agents, embed_dim, hypernet_embed

    s = s_ref[...]                                   # (S, T)  mxu dtype
    q = q_ref[...]                                   # (A, T)  f32

    # ---- stage 1 (fused): rows = [h1 (H) | hf (H) | hv (E) | b1 (E)] -------
    z1 = jnp.dot(w1_ref[...], s,
                 preferred_element_type=jnp.float32) + b1_ref[...]   # (2H+2E, T)
    h12 = jnp.maximum(z1[:2 * H, :], 0.0)            # ReLU(h1 ; hf)   (2H, T)
    hv = jnp.maximum(z1[2 * H:2 * H + E, :], 0.0)    # ReLU(V hidden)  (E, T)
    b1 = z1[2 * H + E:, :]                           # hyper_b_1 (no ReLU)

    # ---- stage 2 (fused block-diag): rows = [w1_mix (A*E) | w_final (E)] ---
    z2 = jnp.abs(
        jnp.dot(w2_ref[...], h12.astype(w2_ref.dtype),
                preferred_element_type=jnp.float32) + b2_ref[...])   # (A*E+E, T)
    w1_mix = z2[:A * E, :]                           # abs(hyper_w_1)   (A*E, T)
    w_final = z2[A * E:, :]                          # abs(hyper_w_final) (E, T)

    # ---- hidden = ELU( bmm(agent_qs, w1) + b1 ), per row -------------------
    # per-agent bands are 32-sublane-aligned slices; q[a] is a cheap sublane
    # (stride-0) broadcast in this layout.
    acc = b1
    for a in range(A):                               # A small & static
        acc = acc + q[a:a + 1, :] * w1_mix[a * E:(a + 1) * E, :]
    hidden = jnp.where(acc > 0.0, acc, jnp.exp(acc) - 1.0)           # ELU(1)

    # ---- y = bmm(hidden, w_final) + V(s); V's E->1 layer folded into the
    #      same sublane reduction (no width-1 MXU matmul) --------------------
    y = (jnp.sum(hidden * w_final + hv * wv2_ref[...], axis=0, keepdims=True)
         + bv2_ref[...])
    out_ref[...] = y                                 # (1, T), lane-dense store


def qmix_mixer_forward(agent_qs, states, packed, *, num_agents, state_dim,
                       embed_dim, hypernet_embed, tile_rows=512,
                       mxu_dtype=jnp.float32):
    """agent_qs: (bs, T, A), states: (bs, T, S) -> (bs, T, 1)."""
    bs, seq, _ = agent_qs.shape
    n_rows = bs * seq

    # Row tile on the lane axis: multiple of 128, sized well under the v7x
    # 64 MiB / v5e 16 MiB-default scoped-VMEM budgets at f32.
    tile = max(128, min(_round_up(tile_rows, 128), _round_up(n_rows, 128)))
    n_pad = _round_up(n_rows, tile)

    # rows-on-lanes layout: (features, rows); pad rows to the tile boundary.
    q_t = agent_qs.reshape(n_rows, num_agents).T.astype(jnp.float32)   # (A, N)
    s_t = states.reshape(n_rows, state_dim).T.astype(mxu_dtype)        # (S, N)
    if n_pad != n_rows:
        q_t = jnp.pad(q_t, ((0, 0), (0, n_pad - n_rows)))
        s_t = jnp.pad(s_t, ((0, 0), (0, n_pad - n_rows)))

    kernel = functools.partial(qmix_mixer_kernel, num_agents=num_agents,
                               embed_dim=embed_dim,
                               hypernet_embed=hypernet_embed)

    def row_tiled(n_feat):
        return pl.BlockSpec((n_feat, tile), lambda i: (0, i))

    def resident(shape):                      # params stay VMEM-resident
        return pl.BlockSpec(shape, lambda i: (0, 0))

    operands = (q_t, s_t, packed["W1"], packed["B1"], packed["W2"],
                packed["B2"], packed["WV2"], packed["BV2"])
    in_specs = ([row_tiled(num_agents), row_tiled(state_dim)]
                + [resident(p.shape) for p in operands[2:]])

    out = pl.pallas_call(
        kernel,
        out_shape=jax.ShapeDtypeStruct((1, n_pad), jnp.float32),
        grid_spec=pltpu.PrefetchScalarGridSpec(
            num_scalar_prefetch=0,
            grid=(n_pad // tile,),
            in_specs=in_specs,
            out_specs=pl.BlockSpec((1, tile), lambda i: (0, i)),
        ),
        compiler_params=pltpu.CompilerParams(
            dimension_semantics=("parallel",),          # megacore on v7x
            vmem_limit_bytes=32 * 1024 * 1024,
        ),
    )(*operands)

    return out[:, :n_rows].reshape(bs, seq, 1)


def init_params(key, num_agents, state_dim, embed_dim, hypernet_embed):
    """Synthetic per-layer params, stored (in, out) so x @ W + b == torch x @ W.T + b."""
    A, S, E, H = num_agents, state_dim, embed_dim, hypernet_embed
    ks = jax.random.split(key, 14)

    def w(k, shape):
        return jax.random.normal(k, shape, dtype=jnp.float32) * 0.1

    return {
        # hyper_w_1
        "w1a": w(ks[0], (S, H)),     "b1a": w(ks[1], (1, H)),
        "w1b": w(ks[2], (H, A * E)), "b1b": w(ks[3], (1, A * E)),
        # hyper_b_1
        "wb":  w(ks[4], (S, E)),     "bb":  w(ks[5], (1, E)),
        # hyper_w_final
        "wf1": w(ks[6], (S, H)),     "bf1": w(ks[7], (1, H)),
        "wf2": w(ks[8], (H, E)),     "bf2": w(ks[9], (1, E)),
        # V
        "wv1": w(ks[10], (S, E)),    "bv1": w(ks[11], (1, E)),
        "wv2": w(ks[12], (E, 1)),    "bv2": w(ks[13], (1, 1)),
    }


def pack_params(p, *, num_agents, embed_dim, hypernet_embed,
                mxu_dtype=jnp.float32):
    """Pack the 14 per-layer tensors into 2 fused weight slabs (+ biases + V head)."""
    A, E, H = num_agents, embed_dim, hypernet_embed
    # stage-1 slab: out rows = [h1 | hf | hv | b1]
    W1 = jnp.concatenate([p["w1a"], p["wf1"], p["wv1"], p["wb"]], axis=1).T
    B1 = jnp.concatenate([p["b1a"], p["bf1"], p["bv1"], p["bb"]], axis=1).T
    # stage-2 block-diagonal slab: out rows = [w1_mix | w_final], in = [h1 | hf]
    W2 = jnp.zeros((2 * H, A * E + E), jnp.float32)
    W2 = W2.at[:H, :A * E].set(p["w1b"])
    W2 = W2.at[H:, A * E:].set(p["wf2"])
    W2 = W2.T
    B2 = jnp.concatenate([p["b1b"], p["bf2"]], axis=1).T
    return {
        "W1": W1.astype(mxu_dtype),            # (2H+2E, S)
        "B1": B1.astype(jnp.float32),          # (2H+2E, 1)
        "W2": W2.astype(mxu_dtype),            # (A*E+E, 2H)
        "B2": B2.astype(jnp.float32),          # (A*E+E, 1)
        "WV2": p["wv2"].astype(jnp.float32),   # (E, 1)
        "BV2": p["bv2"].astype(jnp.float32),   # (1, 1)
    }


def reference_forward(agent_qs, states, p, *, num_agents, state_dim, embed_dim):
    """Plain-JAX replica of the PyTorch forward for validation."""
    bs = agent_qs.shape[0]
    s = states.reshape(-1, state_dim)
    q = agent_qs.reshape(-1, 1, num_agents)
    w1 = jnp.abs(jnp.maximum(s @ p["w1a"] + p["b1a"], 0.0) @ p["w1b"] + p["b1b"])
    b1 = (s @ p["wb"] + p["bb"]).reshape(-1, 1, embed_dim)
    w1 = w1.reshape(-1, num_agents, embed_dim)
    hidden = jax.nn.elu(jnp.einsum("bij,bjk->bik", q, w1) + b1)
    wf = jnp.abs(jnp.maximum(s @ p["wf1"] + p["bf1"], 0.0) @ p["wf2"] + p["bf2"])
    wf = wf.reshape(-1, embed_dim, 1)
    v = (jnp.maximum(s @ p["wv1"] + p["bv1"], 0.0) @ p["wv2"] + p["bv2"]).reshape(-1, 1, 1)
    y = jnp.einsum("bij,bjk->bik", hidden, wf) + v
    return y.reshape(bs, -1, 1)


if __name__ == "__main__":
    num_agents, state_dim = 4, 32
    embed_dim, hypernet_embed = 32, 64
    bs, seq = 2, 8

    key = jax.random.PRNGKey(0)
    k_p, k_q, k_s = jax.random.split(key, 3)
    params = init_params(k_p, num_agents, state_dim, embed_dim, hypernet_embed)

    agent_qs = jax.random.normal(k_q, (bs, seq, num_agents), dtype=jnp.float32)
    states = jax.random.normal(k_s, (bs, seq, state_dim), dtype=jnp.float32)

    q_ref = reference_forward(agent_qs, states, params,
                              num_agents=num_agents, state_dim=state_dim,
                              embed_dim=embed_dim)

    # ---- f32 MXU operands: strict numerical check --------------------------
    packed_f32 = pack_params(params, num_agents=num_agents, embed_dim=embed_dim,
                             hypernet_embed=hypernet_embed,
                             mxu_dtype=jnp.float32)
    q_tot = qmix_mixer_forward(agent_qs, states, packed_f32,
                               num_agents=num_agents, state_dim=state_dim,
                               embed_dim=embed_dim,
                               hypernet_embed=hypernet_embed,
                               mxu_dtype=jnp.float32)
    q_tot = jax.block_until_ready(q_tot)
    assert q_tot.shape == (bs, seq, 1)
    assert jnp.allclose(q_tot, q_ref, atol=1e-4, rtol=1e-4)

    # ---- bf16 MXU operands (MXU-native on v5e/v6e/v7x): loose check --------
    packed_bf16 = pack_params(params, num_agents=num_agents,
                              embed_dim=embed_dim,
                              hypernet_embed=hypernet_embed,
                              mxu_dtype=jnp.bfloat16)
    q_tot_bf16 = qmix_mixer_forward(agent_qs, states, packed_bf16,
                                    num_agents=num_agents, state_dim=state_dim,
                                    embed_dim=embed_dim,
                                    hypernet_embed=hypernet_embed,
                                    mxu_dtype=jnp.bfloat16)
    q_tot_bf16 = jax.block_until_ready(q_tot_bf16)
    assert jnp.allclose(q_tot_bf16, q_ref, atol=5e-2, rtol=5e-2)

    print("KERNEL_OK")
</pallas_src>

<mosaic_0001>
module attributes {stable_mosaic.version = 11 : i64} {
  func.func @qmix_mixer_kernel(%arg0: i32, %arg1: memref<4x128xf32, #tpu.memory_space<vmem>>, %arg2: memref<32x128xf32, #tpu.memory_space<vmem>>, %arg3: memref<192x32xf32, #tpu.memory_space<vmem>>, %arg4: memref<192x1xf32, #tpu.memory_space<vmem>>, %arg5: memref<160x128xf32, #tpu.memory_space<vmem>>, %arg6: memref<160x1xf32, #tpu.memory_space<vmem>>, %arg7: memref<32x1xf32, #tpu.memory_space<vmem>>, %arg8: memref<1x1xf32, #tpu.memory_space<vmem>>, %arg9: memref<1x128xf32, #tpu.memory_space<vmem>>) attributes {dimension_semantics = [#tpu.dimension_semantics<parallel>], iteration_bounds = array<i64: 1>, scalar_prefetch = 0 : i64, scratch_operands = 0 : i64, tpu.core_type = #tpu.core_type<tc>, window_params = [{transform_indices = @transform_0, window_bounds = array<i64: 4, 128>}, {transform_indices = @transform_1, window_bounds = array<i64: 32, 128>}, {pipeline_mode = #tpu.pipeline_mode<synchronous>, transform_indices = @transform_2, window_bounds = array<i64: 192, 32>}, {pipeline_mode = #tpu.pipeline_mode<synchronous>, transform_indices = @transform_3, window_bounds = array<i64: 192, 1>}, {pipeline_mode = #tpu.pipeline_mode<synchronous>, transform_indices = @transform_4, window_bounds = array<i64: 160, 128>}, {pipeline_mode = #tpu.pipeline_mode<synchronous>, transform_indices = @transform_5, window_bounds = array<i64: 160, 1>}, {pipeline_mode = #tpu.pipeline_mode<synchronous>, transform_indices = @transform_6, window_bounds = array<i64: 32, 1>}, {pipeline_mode = #tpu.pipeline_mode<synchronous>, transform_indices = @transform_7, window_bounds = array<i64: 1, 1>}, {transform_indices = @transform_8, window_bounds = array<i64: 1, 128>}]} {
    %c0 = arith.constant 0 : index
    %c0_0 = arith.constant 0 : index
    %0 = vector.load %arg2[%c0, %c0_0] : memref<32x128xf32, #tpu.memory_space<vmem>>, vector<32x128xf32>
    %c0_1 = arith.constant 0 : index
    %c0_2 = arith.constant 0 : index
    %1 = vector.load %arg1[%c0_1, %c0_2] : memref<4x128xf32, #tpu.memory_space<vmem>>, vector<4x128xf32>
    %c0_3 = arith.constant 0 : index
    %c0_4 = arith.constant 0 : index
    %2 = vector.load %arg3[%c0_3, %c0_4] : memref<192x32xf32, #tpu.memory_space<vmem>>, vector<192x32xf32>
    %cst = arith.constant dense<0.000000e+00> : vector<192x128xf32>
    %3 = tpu.matmul %2, %0, %cst {dimension_numbers = #tpu.dot_dimension_numbers<[1], [0], [0], [1], [0, 0, 1, 1], [], []>} : vector<192x32xf32>, vector<32x128xf32>, vector<192x128xf32> -> vector<192x128xf32>
    %c0_5 = arith.constant 0 : index
    %c0_6 = arith.constant 0 : index
    %4 = vector.load %arg4[%c0_5, %c0_6] : memref<192x1xf32, #tpu.memory_space<vmem>>, vector<192x1xf32>
    %5 = vector.broadcast %4 : vector<192x1xf32> to vector<192x128xf32>
    %6 = arith.addf %3, %5 : vector<192x128xf32>
    %7 = vector.extract_strided_slice %6 {offsets = [0, 0], sizes = [128, 128], strides = [1, 1]} : vector<192x128xf32> to vector<128x128xf32>
    %cst_7 = arith.constant 0.000000e+00 : f32
    %8 = vector.broadcast %cst_7 : f32 to vector<128x128xf32>
    %9 = arith.maximumf %7, %8 : vector<128x128xf32>
    %10 = vector.extract_strided_slice %6 {offsets = [128, 0], sizes = [32, 128], strides = [1, 1]} : vector<192x128xf32> to vector<32x128xf32>
    %cst_8 = arith.constant 0.000000e+00 : f32
    %11 = vector.broadcast %cst_8 : f32 to vector<32x128xf32>
    %12 = arith.maximumf %10, %11 : vector<32x128xf32>
    %13 = vector.extract_strided_slice %6 {offsets = [160, 0], sizes = [32, 128], strides = [1, 1]} : vector<192x128xf32> to vector<32x128xf32>
    %c0_9 = arith.constant 0 : index
    %c0_10 = arith.constant 0 : index
    %14 = vector.load %arg5[%c0_9, %c0_10] : memref<160x128xf32, #tpu.memory_space<vmem>>, vector<160x128xf32>
    %cst_11 = arith.constant dense<0.000000e+00> : vector<160x128xf32>
    %15 = tpu.matmul %14, %9, %cst_11 {dimension_numbers = #tpu.dot_dimension_numbers<[1], [0], [0], [1], [0, 0, 1, 1], [], []>} : vector<160x128xf32>, vector<128x128xf32>, vector<160x128xf32> -> vector<160x128xf32>
    %c0_12 = arith.constant 0 : index
    %c0_13 = arith.constant 0 : index
    %16 = vector.load %arg6[%c0_12, %c0_13] : memref<160x1xf32, #tpu.memory_space<vmem>>, vector<160x1xf32>
    %17 = vector.broadcast %16 : vector<160x1xf32> to vector<160x128xf32>
    %18 = arith.addf %15, %17 : vector<160x128xf32>
    %19 = math.absf %18 : vector<160x128xf32>
    %20 = vector.extract_strided_slice %19 {offsets = [0, 0], sizes = [128, 128], strides = [1, 1]} : vector<160x128xf32> to vector<128x128xf32>
    %21 = vector.extract_strided_slice %19 {offsets = [128, 0], sizes = [32, 128], strides = [1, 1]} : vector<160x128xf32> to vector<32x128xf32>
    %22 = vector.extract_strided_slice %1 {offsets = [0, 0], sizes = [1, 128], strides = [1, 1]} : vector<4x128xf32> to vector<1x128xf32>
    %23 = vector.extract_strided_slice %20 {offsets = [0, 0], sizes = [32, 128], strides = [1, 1]} : vector<128x128xf32> to vector<32x128xf32>
    %24 = vector.broadcast %22 : vector<1x128xf32> to vector<32x128xf32>
    %25 = arith.mulf %24, %23 : vector<32x128xf32>
    %26 = arith.addf %13, %25 : vector<32x128xf32>
    %27 = vector.extract_strided_slice %1 {offsets = [1, 0], sizes = [1, 128], strides = [1, 1]} : vector<4x128xf32> to vector<1x128xf32>
    %28 = vector.extract_strided_slice %20 {offsets = [32, 0], sizes = [32, 128], strides = [1, 1]} : vector<128x128xf32> to vector<32x128xf32>
    %29 = vector.broadcast %27 : vector<1x128xf32> to vector<32x128xf32>
    %30 = arith.mulf %29, %28 : vector<32x128xf32>
    %31 = arith.addf %26, %30 : vector<32x128xf32>
    %32 = vector.extract_strided_slice %1 {offsets = [2, 0], sizes = [1, 128], strides = [1, 1]} : vector<4x128xf32> to vector<1x128xf32>
    %33 = vector.extract_strided_slice %20 {offsets = [64, 0], sizes = [32, 128], strides = [1, 1]} : vector<128x128xf32> to vector<32x128xf32>
    %34 = vector.broadcast %32 : vector<1x128xf32> to vector<32x128xf32>
    %35 = arith.mulf %34, %33 : vector<32x128xf32>
    %36 = arith.addf %31, %35 : vector<32x128xf32>
    %37 = vector.extract_strided_slice %1 {offsets = [3, 0], sizes = [1, 128], strides = [1, 1]} : vector<4x128xf32> to vector<1x128xf32>
    %38 = vector.extract_strided_slice %20 {offsets = [96, 0], sizes = [32, 128], strides = [1, 1]} : vector<128x128xf32> to vector<32x128xf32>
    %39 = vector.broadcast %37 : vector<1x128xf32> to vector<32x128xf32>
    %40 = arith.mulf %39, %38 : vector<32x128xf32>
    %41 = arith.addf %36, %40 : vector<32x128xf32>
    %cst_14 = arith.constant 0.000000e+00 : f32
    %42 = vector.broadcast %cst_14 : f32 to vector<32x128xf32>
    %43 = arith.cmpf ogt, %41, %42 : vector<32x128xf32>
    %44 = math.exp %41 : vector<32x128xf32>
    %cst_15 = arith.constant 1.000000e+00 : f32
    %45 = vector.broadcast %cst_15 : f32 to vector<32x128xf32>
    %46 = arith.subf %44, %45 : vector<32x128xf32>
    %47 = arith.select %43, %41, %46 : vector<32x128xi1>, vector<32x128xf32>
    %48 = arith.mulf %47, %21 : vector<32x128xf32>
    %c0_16 = arith.constant 0 : index
    %c0_17 = arith.constant 0 : index
    %49 = vector.load %arg7[%c0_16, %c0_17] : memref<32x1xf32, #tpu.memory_space<vmem>>, vector<32x1xf32>
    %50 = vector.broadcast %49 : vector<32x1xf32> to vector<32x128xf32>
    %51 = arith.mulf %12, %50 : vector<32x128xf32>
    %52 = arith.addf %48, %51 : vector<32x128xf32>
    %cst_18 = arith.constant dense<0.000000e+00> : vector<128xf32>
    %53 = vector.multi_reduction <add>, %52, %cst_18 [0] : vector<32x128xf32> to vector<128xf32>
    %54 = vector.shape_cast %53 : vector<128xf32> to vector<1x128xf32>
    %c0_19 = arith.constant 0 : index
    %c0_20 = arith.constant 0 : index
    %55 = vector.load %arg8[%c0_19, %c0_20] : memref<1x1xf32, #tpu.memory_space<vmem>>, vector<1x1xf32>
    %56 = vector.broadcast %55 : vector<1x1xf32> to vector<1x128xf32>
    %57 = arith.addf %54, %56 : vector<1x128xf32>
    %c0_21 = arith.constant 0 : index
    %c0_22 = arith.constant 0 : index
    %58 = vector.load %arg9[%c0_21, %c0_22] : memref<1x128xf32, #tpu.memory_space<vmem>>, vector<1x128xf32>
    tpu.vector_store %arg9[%c0_21, %c0_22], %57 {strides = array<i32>} : memref<1x128xf32, #tpu.memory_space<vmem>>, vector<1x128xf32>,
    return
  }
  func.func @transform_0(%arg0: i32) -> (i32, i32) {
    %c0_i32 = arith.constant 0 : i32
    %c0_i32_0 = arith.constant 0 : i32
    return %c0_i32, %arg0 : i32, i32
  }
  func.func @transform_1(%arg0: i32) -> (i32, i32) {
    %c0_i32 = arith.constant 0 : i32
    %c0_i32_0 = arith.constant 0 : i32
    return %c0_i32, %arg0 : i32, i32
  }
  func.func @transform_2(%arg0: i32) -> (i32, i32) {
    %c0_i32 = arith.constant 0 : i32
    %c0_i32_0 = arith.constant 0 : i32
    %c0_i32_1 = arith.constant 0 : i32
    return %c0_i32, %c0_i32_0 : i32, i32
  }
  func.func @transform_3(%arg0: i32) -> (i32, i32) {
    %c0_i32 = arith.constant 0 : i32
    %c0_i32_0 = arith.constant 0 : i32
    %c0_i32_1 = arith.constant 0 : i32
    return %c0_i32, %c0_i32_0 : i32, i32
  }
  func.func @transform_4(%arg0: i32) -> (i32, i32) {
    %c0_i32 = arith.constant 0 : i32
    %c0_i32_0 = arith.constant 0 : i32
    %c0_i32_1 = arith.constant 0 : i32
    return %c0_i32, %c0_i32_0 : i32, i32
  }
  func.func @transform_5(%arg0: i32) -> (i32, i32) {
    %c0_i32 = arith.constant 0 : i32
    %c0_i32_0 = arith.constant 0 : i32
    %c0_i32_1 = arith.constant 0 : i32
    return %c0_i32, %c0_i32_0 : i32, i32
  }
  func.func @transform_6(%arg0: i32) -> (i32, i32) {
    %c0_i32 = arith.constant 0 : i32
    %c0_i32_0 = arith.constant 0 : i32
    %c0_i32_1 = arith.constant 0 : i32
    return %c0_i32, %c0_i32_0 : i32, i32
  }
  func.func @transform_7(%arg0: i32) -> (i32, i32) {
    %c0_i32 = arith.constant 0 : i32
    %c0_i32_0 = arith.constant 0 : i32
    %c0_i32_1 = arith.constant 0 : i32
    return %c0_i32, %c0_i32_0 : i32, i32
  }
  func.func @transform_8(%arg0: i32) -> (i32, i32) {
    %c0_i32 = arith.constant 0 : i32
    %c0_i32_0 = arith.constant 0 : i32
    return %c0_i32, %arg0 : i32, i32
  }
}

</mosaic_0001>

<bundles_post_ra>
// kernel: tpu_custom_call.1
= control target key start
LH: loop header
LB: loop body
LE: loop exit
PB: predicated region body
PF: predicated region fallthrough
CT: control target
= control target key end

     0   :  { %s1628_s0 = inlined_call_operand.vmem [shape: f32[4,128], index: 0, kind: input, shape index: {}]   ;;  %s1629_s1 = inlined_call_operand.vmem [shape: f32[32,128], index: 1, kind: input, shape index: {}]   ;;  %s1630_s2 = inlined_call_operand.vmem [shape: f32[192,32], index: 2, kind: input, shape index: {}]   ;;  %s1631_s3 = inlined_call_operand.vmem [shape: f32[192,1], index: 3, kind: input, shape index: {}]   ;;  %s1632_s4 = inlined_call_operand.vmem [shape: f32[160,128], index: 4, kind: input, shape index: {}]   ;;  %s1633_s5 = inlined_call_operand.vmem [shape: f32[160,1], index: 5, kind: input, shape index: {}]   ;;  %s1634_s6 = inlined_call_operand.vmem [shape: f32[32,1], index: 6, kind: input, shape index: {}]   ;;  %s1635_s7 = inlined_call_operand.<no memory space> [shape: f32[1,1], index: 7, kind: input, shape index: {}]   ;;  %s1636_s8 = inlined_call_operand.hbm [shape: f32[1,128], index: 8, kind: output, shape index: {}]  }
   0x1   :  { %v13_v0 = vstv %s1635_s7 }
   0x2   :  { %14 = vst [vmem:[#allocation2] sm:$0x1] %v13_v0 }
   0x3   :  { %v35_v1 = vld [vmem:[%s1629_s1 + $0x18] sm:$0xff]  ;;  %v34_v2 = vld [vmem:[%s1629_s1 + $0x10] sm:$0xff]  ;;  %vm205_vm0 = vcmask 261120   ;;  %v1211_v3 = vmov 0   ;;  %v37_v4 = vld [vmem:[%s1630_s2] sm:$0xff] }
   0x4   :  { %1039 = vmatprep.subr.mxu0 %v35_v1  ;;  %1179 = vset.pattern.permute.xlu0 %v1211_v3  ;;  %v76_v5 = vld [vmem:[%s1631_s3 + $0x78] sm:$0xff]  ;;  %v33_v6 = vld [vmem:[%s1629_s1 + $0x8] sm:$0xff]  ;;  %v32_v7 = vld [vmem:[%s1629_s1] sm:$0xff] }
   0x5   :  { %1040 = vmatpush3.msra.mxu0 %v35_v1  ;;  %1047 = vmatprep.mubr.msk.f32.mxu0 %vm205_vm0, %v37_v4  ;;  %v75_v8 = vld [vmem:[%s1631_s3 + $0x70] sm:$0xff]  ;;  %v74_v9 = vld [vmem:[%s1631_s3 + $0x68] sm:$0xff]  ;;  %v73_v11 = vld [vmem:[%s1631_s3 + $0x60] sm:$0xff] }
   0x6   :  { %1041 = vmatprep.subr.mxu0 %v34_v2  ;;  %162 = vperm.xlu0 %1179, %v76_v5   ;;  %v38_v10 = vld [vmem:[%s1630_s2 + $0x8] sm:$0xff]  ;;  %v39_v12 = vld [vmem:[%s1630_s2 + $0x10] sm:$0xff]  ;;  %v72_v13 = vld [vmem:[%s1631_s3 + $0x58] sm:$0xff] }
   0x7   :  { %1042 = vmatpush3.msra.mxu0 %v34_v2  ;;  %1180 = vset.pattern.permute.xlu1 %v1211_v3  ;;  %v40_v14 = vld [vmem:[%s1630_s2 + $0x18] sm:$0xff]  ;;  %v71_v15 = vld [vmem:[%s1631_s3 + $0x50] sm:$0xff]  ;;  %v41_v16 = vld [vmem:[%s1630_s2 + $0x20] sm:$0xff] }
   0x8   :  { %1043 = vmatprep.subr.mxu0 %v33_v6  ;;  %152 = vperm.xlu1 %1180, %v74_v9   ;;  %v70_v17 = vld [vmem:[%s1631_s3 + $0x48] sm:$0xff]  ;;  %v69_v19 = vld [vmem:[%s1631_s3 + $0x40] sm:$0xff]  ;;  %v43_v20 = vld [vmem:[%s1630_s2 + $0x30] sm:$0xff] }
   0x9   :  { %1044 = vmatpush3.msra.mxu0 %v33_v6  ;;  %v42_v18 = vld [vmem:[%s1630_s2 + $0x28] sm:$0xff]  ;;  %v68_v21 = vld [vmem:[%s1631_s3 + $0x38] sm:$0xff]  ;;  %v67_v23 = vld [vmem:[%s1631_s3 + $0x30] sm:$0xff] }
   0xa   :  { %1045 = vmatprep.subr.mxu0 %v32_v7  ;;  %157 = vperm.xlu0 %1179, %v75_v8   ;;  %v44_v22 = vld [vmem:[%s1630_s2 + $0x38] sm:$0xff]  ;;  %v45_v24 = vld [vmem:[%s1630_s2 + $0x40] sm:$0xff]  ;;  %v66_v25 = vld [vmem:[%s1631_s3 + $0x28] sm:$0xff] }
   0xb   :  { %1046 = vmatpush3.msra.mxu0 %v32_v7  ;;  %v46_v26 = vld [vmem:[%s1630_s2 + $0x48] sm:$0xff]  ;;  %v65_v27 = vld [vmem:[%s1631_s3 + $0x20] sm:$0xff]  ;;  %v47_v28 = vld [vmem:[%s1630_s2 + $0x50] sm:$0xff] }
   0xc   :  { %1048 = vmatmul.mubr.msk.f32.vlgmr.msra.gmra.mxu0 %vm205_vm0, %v38_v10  ;;  %147 = vperm.xlu1 %1180, %v73_v11   ;;  %v64_v29 = vld [vmem:[%s1631_s3 + $0x18] sm:$0xff] }
   0xd   :  { %1050 = vmatprep.mubr.msk.f32.mxu0 %vm205_vm0, %v39_v12 }
   0xe   :  { %142 = vperm.xlu0 %1179, %v72_v13  }
  0x10   :  { %1051 = vmatmul.mubr.msk.f32.gmra.mxu0 %vm205_vm0, %v40_v14  ;;  %137 = vperm.xlu1 %1180, %v71_v15  }
  0x11   :  { %1053 = vmatprep.mubr.msk.f32.mxu0 %vm205_vm0, %v41_v16 }
  0x12   :  { %132 = vperm.xlu0 %1179, %v70_v17  }
  0x14   :  { %1054 = vmatmul.mubr.msk.f32.gmra.mxu0 %vm205_vm0, %v42_v18  ;;  %127 = vperm.xlu1 %1180, %v69_v19  }
  0x15   :  { %1056 = vmatprep.mubr.msk.f32.mxu0 %vm205_vm0, %v43_v20 }
  0x16   :  { %122 = vperm.xlu0 %1179, %v68_v21  }
  0x18   :  { %1057 = vmatmul.mubr.msk.f32.gmra.mxu0 %vm205_vm0, %v44_v22  ;;  %117 = vperm.xlu1 %1180, %v67_v23  }
  0x19   :  { %1059 = vmatprep.mubr.msk.f32.mxu0 %vm205_vm0, %v45_v24 }
  0x1a   :  { %112 = vperm.xlu0 %1179, %v66_v25  }
  0x1c   :  { %1060 = vmatmul.mubr.msk.f32.gmra.mxu0 %vm205_vm0, %v46_v26  ;;  %107 = vperm.xlu1 %1180, %v65_v27  }
  0x1d   :  { %15 = vsyncpa [#allocation4], 0  ;;  %1062 = vmatprep.mubr.msk.f32.mxu0 %vm205_vm0, %v47_v28  ;;  %v48_v30 = vld [vmem:[%s1630_s2 + $0x58] sm:$0xff]  ;;  %v63_v31 = vld [vmem:[%s1631_s3 + $0x10] sm:$0xff] }
  0x1e   :  { %v49_v32 = vld [vmem:[%s1630_s2 + $0x60] sm:$0xff]  ;;  %102 = vperm.xlu0 %1179, %v64_v29   ;;  %v62_v33 = vld [vmem:[%s1631_s3 + $0x8] sm:$0xff]  ;;  %v51_v36 = vld [vmem:[%s1630_s2 + $0x70] sm:$0xff] }
  0x1f   :  { %v50_v34 = vld [vmem:[%s1630_s2 + $0x68] sm:$0xff]  ;;  %v61_v35 = vld [vmem:[%s1631_s3] sm:$0xff]  ;;  %v52_v38 = vld [vmem:[%s1630_s2 + $0x78] sm:$0xff] }
  0x20   :  { %1063 = vmatmul.mubr.msk.f32.gmra.mxu0 %vm205_vm0, %v48_v30  ;;  %97 = vperm.xlu1 %1180, %v63_v31   ;;  %v77_v37 = vld [vmem:[%s1631_s3 + $0x80] sm:$0xff]  ;;  %v78_v39 = vld [vmem:[%s1631_s3 + $0x88] sm:$0xff]  ;;  %v79_v41 = vld [vmem:[%s1631_s3 + $0x90] sm:$0xff] }
  0x21   :  { %1065 = vmatprep.mubr.msk.f32.mxu0 %vm205_vm0, %v49_v32  ;;  %v53_v40 = vld [vmem:[%s1630_s2 + $0x80] sm:$0xff]  ;;  %v54_v42 = vld [vmem:[%s1630_s2 + $0x88] sm:$0xff]  ;;  %v55_v44 = vld [vmem:[%s1630_s2 + $0x90] sm:$0xff] }
  0x22   :  { %92 = vperm.xlu0 %1179, %v62_v33   ;;  %v503_v43 = vld [vmem:[%s1633_s5] sm:$0xff]  ;;  %v504_v45 = vld [vmem:[%s1633_s5 + $0x8] sm:$0xff]  ;;  %v56_v46 = vld [vmem:[%s1630_s2 + $0x98] sm:$0xff] }
  0x23   :  { %v505_v47 = vld [vmem:[%s1633_s5 + $0x10] sm:$0xff]  ;;  %v57_v48 = vld [vmem:[%s1630_s2 + $0xa0] sm:$0xff]  ;;  %v58_v50 = vld [vmem:[%s1630_s2 + $0xa8] sm:$0xff] }
  0x24   :  { %1066 = vmatmul.mubr.msk.f32.gmra.mxu0 %vm205_vm0, %v50_v34  ;;  %87 = vperm.xlu1 %1180, %v61_v35   ;;  %v507_v49 = vld [vmem:[%s1633_s5 + $0x20] sm:$0xff]  ;;  %v508_v51 = vld [vmem:[%s1633_s5 + $0x28] sm:$0xff]  ;;  %v59_v52 = vld [vmem:[%s1630_s2 + $0xb0] sm:$0xff] }
  0x25   :  { %1068 = vmatprep.mubr.msk.f32.mxu0 %vm205_vm0, %v51_v36  ;;  %v81_v53 = vld [vmem:[%s1631_s3 + $0xa0] sm:$0xff]  ;;  %v60_v54 = vld [vmem:[%s1630_s2 + $0xb8] sm:$0xff]  ;;  %v82_v55 = vld [vmem:[%s1631_s3 + $0xa8] sm:$0xff] }
  0x26   :  { %167 = vperm.xlu0 %1179, %v77_v37   ;;  %v506_v56 = vld [vmem:[%s1633_s5 + $0x18] sm:$0xff]  ;;  %v509_v57 = vld [vmem:[%s1633_s5 + $0x30] sm:$0xff]  ;;  %v511_v58 = vld [vmem:[%s1633_s5 + $0x40] sm:$0xff] }
  0x27   :  { %v512_v59 = vld [vmem:[%s1633_s5 + $0x48] sm:$0xff]  ;;  %v83_v60 = vld [vmem:[%s1631_s3 + $0xb0] sm:$0xff]  ;;  %v510_v61 = vld [vmem:[%s1633_s5 + $0x38] sm:$0xff] }
  0x28   :  { %1069 = vmatmul.mubr.msk.f32.gmra.mxu0 %vm205_vm0, %v52_v38  ;;  %172 = vperm.xlu1 %1180, %v78_v39   ;;  %v513_v62 = vld [vmem:[%s1633_s5 + $0x50] sm:$0xff]  ;;  %v515_v63 = vld [vmem:[%s1633_s5 + $0x60] sm:$0xff]  ;;  %v516_v0 = vld [vmem:[%s1633_s5 + $0x68] sm:$0xff] }
  0x29   :  { %1071 = vmatprep.mubr.msk.f32.mxu0 %vm205_vm0, %v53_v40  ;;  %v84_v1 = vld [vmem:[%s1631_s3 + $0xb8] sm:$0xff]  ;;  %v517_v3 = vld [vmem:[%s1633_s5 + $0x70] sm:$0xff]  ;;  %v519_v5 = vld [vmem:[%s1633_s5 + $0x80] sm:$0xff] }
  0x2a   :  { %177 = vperm.xlu0 %1179, %v79_v41   ;;  %v514_v2 = vld [vmem:[%s1633_s5 + $0x58] sm:$0xff]  ;;  %v520_v6 = vld [vmem:[%s1633_s5 + $0x88] sm:$0xff]  ;;  %v521_v7 = vld [vmem:[%s1633_s5 + $0x90] sm:$0xff] }
  0x2b   :  { %v518_v4 = vld [vmem:[%s1633_s5 + $0x78] sm:$0xff]  ;;  %v880_v10 = vld [vmem:[%s1634_s6] sm:$0xff]  ;;  %v881_v11 = vld [vmem:[%s1634_s6 + $0x8] sm:$0xff] }
  0x2c   :  { %1072 = vmatmul.mubr.msk.f32.gmra.mxu0 %vm205_vm0, %v54_v42  ;;  %525 = vperm.xlu1 %1180, %v503_v43   ;;  %v80_v8 = vld [vmem:[%s1631_s3 + $0x98] sm:$0xff]  ;;  %v882_v12 = vld [vmem:[%s1634_s6 + $0x10] sm:$0xff]  ;;  %v921_v14 = vld [vmem:[#allocation2] sm:$0x1] }
  0x2d   :  { %1074 = vmatprep.mubr.msk.f32.mxu0 %vm205_vm0, %v55_v44  ;;  %v522_v9 = vld [vmem:[%s1633_s5 + $0x98] sm:$0xff]  ;;  %v483_v15 = vld [vmem:[%s1632_s4] sm:$0xff] }
  0x2e   :  { %530 = vperm.xlu0 %1179, %v504_v45   ;;  %v883_v13 = vld [vmem:[%s1634_s6 + $0x18] sm:$0xff]  ;;  %v487_v16 = vld [vmem:[%s1632_s4 + $0x20] sm:$0xff] }
  0x2f   :  { %1121 = vmatprep.mubr.f32.mxu1 %v487_v16 }
  0x30   :  { %1075 = vmatmul.mubr.msk.f32.gmra.mxu0 %vm205_vm0, %v56_v46  ;;  %535 = vperm.xlu1 %1180, %v505_v47  }
  0x31   :  { %1077 = vmatprep.mubr.msk.f32.mxu0 %vm205_vm0, %v57_v48 }
  0x32   :  { %545 = vperm.xlu0 %1179, %v507_v49  }
  0x34   :  { %1078 = vmatmul.mubr.msk.f32.gmra.mxu0 %vm205_vm0, %v58_v50  ;;  %550 = vperm.xlu1 %1180, %v508_v51  }
  0x35   :  { %1080 = vmatprep.mubr.msk.f32.mxu0 %vm205_vm0, %v59_v52 }
  0x36   :  { %187 = vperm.xlu0 %1179, %v81_v53  }
  0x38   :  { %1081 = vmatmul.mubr.msk.f32.gmra.mxu0 %vm205_vm0, %v60_v54  ;;  %192 = vperm.xlu1 %1180, %v82_v55  }
  0x39   :  { %1115 = vmatprep.mubr.f32.mxu0 %v483_v15 }
  0x3a   :  { %540 = vperm.xlu0 %1179, %v506_v56  }
  0x3c   :  { %555 = vperm.xlu1 %1180, %v509_v57  }
  0x3e   :  { %565 = vperm.xlu0 %1179, %v511_v58  }
  0x40   :  { %570 = vperm.xlu1 %1180, %v512_v59  }
  0x42   :  { %197 = vperm.xlu0 %1179, %v83_v60  }
  0x44   :  { %560 = vperm.xlu1 %1180, %v510_v61  }
  0x46   :  { %575 = vperm.xlu0 %1179, %v513_v62  }
  0x48   :  { %585 = vperm.xlu1 %1180, %v515_v63  }
  0x4a   :  { %590 = vperm.xlu0 %1179, %v516_v0  }
  0x4c   :  { %202 = vperm.xlu1 %1180, %v84_v1  }
  0x4e   :  { %580 = vperm.xlu0 %1179, %v514_v2  }
  0x50   :  { %595 = vperm.xlu1 %1180, %v517_v3  }
  0x52   :  { %600 = vperm.xlu0 %1179, %v518_v4  }
  0x54   :  { %605 = vperm.xlu1 %1180, %v519_v5  }
  0x56   :  { %610 = vperm.xlu0 %1179, %v520_v6  }
  0x58   :  { %615 = vperm.xlu1 %1180, %v521_v7  }
  0x5a   :  { %182 = vperm.xlu0 %1179, %v80_v8  }
  0x5c   :  { %620 = vperm.xlu1 %1180, %v522_v9  }
  0x5e   :  { %886 = vperm.xlu0 %1179, %v880_v10  }
  0x60   :  { %891 = vperm.xlu1 %1180, %v881_v11  }
  0x62   :  { %896 = vperm.xlu0 %1179, %v882_v12  }
  0x64   :  { %901 = vperm.xlu1 %1180, %v883_v13  }
  0x66   :  { %924 = vperm.xlu0 %1179, %v921_v14  }
  0x81   :  { %v163_v23 = vpop.permute.xlu0 %162 }
  0x83   :  { %v153_v25 = vpop.permute.xlu1 %152 }
  0x85   :  { %v158_v28 = vpop.permute.xlu0 %157 }
  0x87   :  { %v148_v30 = vpop.permute.xlu1 %147 }
  0x89   :  { %v143_v33 = vpop.permute.xlu0 %142 }
  0x8b   :  { %v138_v35 = vpop.permute.xlu1 %137 }
  0x8d   :  { %v133_v39 = vpop.permute.xlu0 %132 }
  0x8f   :  { %v128_v44 = vpop.permute.xlu1 %127 }
  0x91   :  { %v123_v49 = vpop.permute.xlu0 %122 }
  0x93   :  { %v118_v52 = vpop.permute.xlu1 %117 }
  0x95   :  { %v113_v57 = vpop.permute.xlu0 %112 }
  0x97   :  { %v108_v60 = vpop.permute.xlu1 %107 }
  0x99   :  { %v103_v1 = vpop.permute.xlu0 %102 }
  0x9b   :  { %v98_v4 = vpop.permute.xlu1 %97 }
  0x9d   :  { %v93_v9 = vpop.permute.xlu0 %92 }
  0x9f   :  { %v88_v12 = vpop.permute.xlu1 %87 }
  0xcc   :  { %v1519_v17 = vpop.f32.mrf.mxu0 }
  0xcd   :  { %v350_v10 = vadd.f32 %v1519_v17, %v93_v9  ;;  %v484_v17 = vld [vmem:[%s1632_s4 + $0x8] sm:$0xff] }
  0xce   :  { %v1521_v18 = vpop.f32.mrf.mxu0 }
  0xcf   :  { %v345_v13 = vadd.f32 %v1521_v18, %v88_v12  ;;  %v464_v15 = vmax.f32 %v350_v10, 0.0  ;;  %v488_v18 = vld [vmem:[%s1632_s4 + $0x28] sm:$0xff] }
  0xd0   :  { %v1523_v19 = vpop.f32.mrf.mxu0 }
  0xd1   :  { %v360_v5 = vadd.f32 %v1523_v19, %v103_v1  ;;  %v463_v16 = vmax.f32 %v345_v13, 0.0  ;;  %v485_v19 = vld [vmem:[%s1632_s4 + $0x10] sm:$0xff] }
  0xd2   :  { %v1525_v20 = vpop.f32.mrf.mxu0 }
  0xd3   :  { %v355_v7 = vadd.f32 %v1525_v20, %v98_v4  ;;  %v466_v11 = vmax.f32 %v360_v5, 0.0  ;;  %v489_v20 = vld [vmem:[%s1632_s4 + $0x30] sm:$0xff] }
  0xd4   :  { %v1527_v21 = vpop.f32.mrf.mxu0 }
  0xd5   :  { %v370_v63 = vadd.f32 %v1527_v21, %v113_v57  ;;  %v465_v14 = vmax.f32 %v355_v7, 0.0  ;;  %v486_v21 = vld [vmem:[%s1632_s4 + $0x18] sm:$0xff]  ;;  %v808_v57 = vlaneseq }
  0xd6   :  { %v1529_v22 = vpop.f32.mrf.mxu0 }
  0xd7   :  { %v365_v2 = vadd.f32 %v1529_v22, %v108_v60  ;;  %v468_v6 = vmax.f32 %v370_v63, 0.0  ;;  %v490_v22 = vld [vmem:[%s1632_s4 + $0x38] sm:$0xff]  ;;  %v1605_v63 = vshrl.u32 %v808_v57, 7 }
  0xd8   :  { %v1058_v24 = vpop.f32.mrf.mxu0 }
  0xd9   :  { %v380_v58 = vadd.f32 %v1058_v24, %v123_v49  ;;  %v467_v8 = vmax.f32 %v365_v2, 0.0  ;;  %v492_v24 = vld [vmem:[%s1632_s4 + $0x48] sm:$0xff] }
  0xda   :  { %v374_v26 = vpop.f32.mrf.mxu0 }
  0xdb   :  { %v375_v61 = vadd.f32 %v374_v26, %v118_v52  ;;  %v470_v0 = vmax.f32 %v380_v58, 0.0  ;;  %v494_v26 = vld [vmem:[%s1632_s4 + $0x58] sm:$0xff] }
  0xdc   :  { %v1061_v27 = vpop.f32.mrf.mxu0 }
  0xdd   :  { %v390_v53 = vadd.f32 %v1061_v27, %v133_v39  ;;  %v469_v3 = vmax.f32 %v375_v61, 0.0  ;;  %v495_v27 = vld [vmem:[%s1632_s4 + $0x60] sm:$0xff] }
  0xde   :  { %v384_v29 = vpop.f32.mrf.mxu0 }
  0xdf   :  { %v385_v55 = vadd.f32 %v384_v29, %v128_v44  ;;  %v472_v59 = vmax.f32 %v390_v53, 0.0  ;;  %v497_v29 = vld [vmem:[%s1632_s4 + $0x70] sm:$0xff] }
  0xe0   :  { %v1064_v31 = vpop.f32.mrf.mxu0 }
  0xe1   :  { %v400_v47 = vadd.f32 %v1064_v31, %v143_v33  ;;  %v471_v62 = vmax.f32 %v385_v55, 0.0  ;;  %v499_v31 = vld [vmem:[%s1632_s4 + $0x80] sm:$0xff]  ;;  %v501_v33 = vld [vmem:[%s1632_s4 + $0x90] sm:$0xff] }
  0xe2   :  { %v394_v32 = vpop.f32.mrf.mxu0 }
  0xe3   :  { %v395_v50 = vadd.f32 %v394_v32, %v138_v35  ;;  %v474_v54 = vmax.f32 %v400_v47, 0.0  ;;  %v500_v32 = vld [vmem:[%s1632_s4 + $0x88] sm:$0xff]  ;;  %v1591_v35 = vpop.permute.xlu0 %167 }
  0xe4   :  { %v1067_v34 = vpop.f32.mrf.mxu0 }
  0xe5   :  { %v410_v41 = vadd.f32 %v1067_v34, %v153_v25  ;;  %v473_v56 = vmax.f32 %v395_v50, 0.0  ;;  %v493_v25 = vld [vmem:[%s1632_s4 + $0x50] sm:$0xff]  ;;  %v502_v34 = vld [vmem:[%s1632_s4 + $0x98] sm:$0xff] }
  0xe6   :  { %v404_v36 = vpop.f32.mrf.mxu0 }
  0xe7   :  { %v405_v45 = vadd.f32 %v404_v36, %v148_v30  ;;  %v476_v48 = vmax.f32 %v410_v41, 0.0  ;;  %v498_v30 = vld [vmem:[%s1632_s4 + $0x78] sm:$0xff]  ;;  %v1593_v36 = vpop.permute.xlu0 %177 }
  0xe8   :  { %v1070_v37 = vpop.f32.mrf.mxu0 }
  0xe9   :  { %v420_v38 = vadd.f32 %v1070_v37, %v163_v23  ;;  %v475_v51 = vmax.f32 %v405_v45, 0.0  ;;  %v491_v23 = vld [vmem:[%s1632_s4 + $0x40] sm:$0xff]  ;;  %v1595_v37 = vpop.permute.xlu1 %172 }
  0xea   :  { %v414_v40 = vpop.f32.mrf.mxu0 }
  0xeb   :  { %v478_v42 = vmax.f32 %v420_v38, 0.0  ;;  %v415_v43 = vadd.f32 %v414_v40, %v158_v28  ;;  %v496_v28 = vld [vmem:[%s1632_s4 + $0x68] sm:$0xff]  ;;  %v531_v38 = vpop.permute.xlu0 %530 }
  0xec   :  { %v1597_v41 = vpop.f32.mrf.mxu0 }
  0xed   :  { %v477_v46 = vmax.f32 %v415_v43, 0.0  ;;  %1083 = vmatprep.subr.mxu0 %v478_v42  ;;  %1145 = vmatprep.subr.mxu1 %v478_v42  ;;  %v526_v39 = vpop.permute.xlu1 %525 }
  0xee   :  { %1084 = vmatpush3.msra.mxu0 %v478_v42  ;;  %1161 = vmatpush3.msra.mxu1 %v478_v42  ;;  %v1599_v43 = vpop.f32.mrf.mxu0 }
  0xef   :  { %1085 = vmatprep.subr.mxu0 %v477_v46  ;;  %1146 = vmatprep.subr.mxu1 %v477_v46  ;;  %v546_v40 = vpop.permute.xlu0 %545 }
  0xf0   :  { %1086 = vmatpush3.msra.mxu0 %v477_v46  ;;  %1162 = vmatpush3.msra.mxu1 %v477_v46  ;;  %v1601_v46 = vpop.f32.mrf.mxu0 }
  0xf1   :  { %1087 = vmatprep.subr.mxu0 %v476_v48  ;;  %1147 = vmatprep.subr.mxu1 %v476_v48  ;;  %v536_v42 = vpop.permute.xlu1 %535 }
  0xf2   :  { %1088 = vmatpush3.msra.mxu0 %v476_v48  ;;  %1163 = vmatpush3.msra.mxu1 %v476_v48  ;;  %v1603_v48 = vpop.f32.mrf.mxu0 }
  0xf3   :  { %1089 = vmatprep.subr.mxu0 %v475_v51  ;;  %1148 = vmatprep.subr.mxu1 %v475_v51  ;;  %v188_v44 = vpop.permute.xlu0 %187 }
  0xf4   :  { %1090 = vmatpush3.msra.mxu0 %v475_v51  ;;  %1164 = vmatpush3.msra.mxu1 %v475_v51  ;;  %v1079_v50 = vpop.f32.mrf.mxu0 }
  0xf5   :  { %1091 = vmatprep.subr.mxu0 %v474_v54  ;;  %1149 = vmatprep.subr.mxu1 %v474_v54  ;;  %v551_v45 = vpop.permute.xlu1 %550 }
  0xf6   :  { %1092 = vmatpush3.msra.mxu0 %v474_v54  ;;  %1165 = vmatpush3.msra.mxu1 %v474_v54  ;;  %v444_v53 = vpop.f32.mrf.mxu0 }
  0xf7   :  { %1093 = vmatprep.subr.mxu0 %v473_v56  ;;  %1150 = vmatprep.subr.mxu1 %v473_v56  ;;  %v541_v47 = vpop.permute.xlu0 %540 }
  0xf8   :  { %1094 = vmatpush3.msra.mxu0 %v473_v56  ;;  %1166 = vmatpush3.msra.mxu1 %v473_v56  ;;  %v1082_v55 = vpop.f32.mrf.mxu0 }
  0xf9   :  { %1095 = vmatprep.subr.mxu0 %v472_v59  ;;  %1151 = vmatprep.subr.mxu1 %v472_v59  ;;  %v193_v49 = vpop.permute.xlu1 %192 }
  0xfa   :  { %1096 = vmatpush3.msra.mxu0 %v472_v59  ;;  %1167 = vmatpush3.msra.mxu1 %v472_v59  ;;  %v454_v58 = vpop.f32.mrf.mxu0 }
  0xfb   :  { %1097 = vmatprep.subr.mxu0 %v471_v62  ;;  %1152 = vmatprep.subr.mxu1 %v471_v62  ;;  %v566_v51 = vpop.permute.xlu0 %565 }
  0xfc   :  { %1098 = vmatpush3.msra.mxu0 %v471_v62  ;;  %1168 = vmatpush3.msra.mxu1 %v471_v62 }
  0xfd   :  { %1099 = vmatprep.subr.mxu0 %v470_v0  ;;  %1153 = vmatprep.subr.mxu1 %v470_v0  ;;  %v556_v52 = vpop.permute.xlu1 %555 }
  0xfe   :  { %1100 = vmatpush3.msra.mxu0 %v470_v0  ;;  %1169 = vmatpush3.msra.mxu1 %v470_v0 }
  0xff   :  { %1101 = vmatprep.subr.mxu0 %v469_v3  ;;  %1154 = vmatprep.subr.mxu1 %v469_v3  ;;  %v198_v54 = vpop.permute.xlu0 %197 }
 0x100   :  { %1102 = vmatpush3.msra.mxu0 %v469_v3  ;;  %1170 = vmatpush3.msra.mxu1 %v469_v3  ;;  %v36_v3 = vld [vmem:[%s1628_s0] sm:$0xf]  ;;  %s1212_s0 = smov [#allocation3]  }
 0x101   :  { %1103 = vmatprep.subr.mxu0 %v468_v6  ;;  %1155 = vmatprep.subr.mxu1 %v468_v6  ;;  %v571_v56 = vpop.permute.xlu1 %570  ;;  %s939_s22 = sshll.u32 %s1212_s0, 4  ;;  %s940_s22 = int_to_ptr.vmem [resolvable:$true] %s939_s22 }
 0x102   :  { %1104 = vmatpush3.msra.mxu0 %v468_v6  ;;  %1171 = vmatpush3.msra.mxu1 %v468_v6  ;;  %s1189_s23 = scalar_lea.vmem %s940_s22, 16  ;;  %s1193_s2 = scalar_lea.vmem %s940_s22, 32 }
 0x103   :  { %1105 = vmatprep.subr.mxu0 %v467_v8  ;;  %1156 = vmatprep.subr.mxu1 %v467_v8  ;;  %v576_v59 = vpop.permute.xlu0 %575  ;;  %p1190_p0 = scmp.ne.s32.totalorder %s940_s22, %s1189_s23  ;;  %p1194_p1 = scmp.lt.s32.totalorder %s940_s22, %s940_s22 }
 0x104   :  { %1106 = vmatpush3.msra.mxu0 %v467_v8  ;;  %1172 = vmatpush3.msra.mxu1 %v467_v8  ;;  %v810_v8 = vsub.s32 0, %v1605_v63  ;;  %p1195_p2 = scmp.lt.s32.totalorder %s1193_s2, %s1189_s23 }
 0x105   :  { %1107 = vmatprep.subr.mxu0 %v466_v11  ;;  %1157 = vmatprep.subr.mxu1 %v466_v11  ;;  %v561_v62 = vpop.permute.xlu1 %560 }
 0x106   :  { %1108 = vmatpush3.msra.mxu0 %v466_v11  ;;  %1173 = vmatpush3.msra.mxu1 %v466_v11  ;;  %v811_v13 = vrot.slane %v36_v3, %v810_v8  ;;  %p1196_p3 = por %p1195_p2, %p1194_p1 }
 0x107   :  { %1109 = vmatprep.subr.mxu0 %v465_v14  ;;  %1158 = vmatprep.subr.mxu1 %v465_v14  ;;  %v591_v7 = vpop.permute.xlu0 %590 }
 0x108   :  { %1110 = vmatpush3.msra.mxu0 %v465_v14  ;;  %1174 = vmatpush3.msra.mxu1 %v465_v14  ;;  %p1197_p4 = pnand %p1196_p3, %p1190_p0 }
 0x109   :  { %1111 = vmatprep.subr.mxu0 %v464_v15  ;;  %1159 = vmatprep.subr.mxu1 %v464_v15  ;;  %v586_v12 = vpop.permute.xlu1 %585 }
 0x10a   :  { %1112 = vmatpush3.msra.mxu0 %v464_v15  ;;  %1175 = vmatpush3.msra.mxu1 %v464_v15  ;;  %v822_v15 = vsub.s32 1, %v1605_v63 }
 0x10b   :  { %1113 = vmatprep.subr.mxu0 %v463_v16  ;;  %1160 = vmatprep.subr.mxu1 %v463_v16 }
 0x10c   :  { %1114 = vmatpush3.msra.mxu0 %v463_v16  ;;  %1176 = vmatpush3.msra.mxu1 %v463_v16 }
 0x10d   :  { %1116 = vmatmul.mubr.f32.vlgmr.msra.gmra.mxu0 %v484_v17  ;;  %1122 = vmatmul.mubr.f32.vlgmr.msra.gmra.mxu1 %v488_v18 }
 0x10e   :  { %1118 = vmatprep.mubr.f32.mxu0 %v485_v19  ;;  %1124 = vmatprep.mubr.f32.mxu1 %v489_v20  ;;  %v834_v19 = vsub.s32 2, %v1605_v63 }
 0x111   :  { %1119 = vmatmul.mubr.f32.gmra.mxu0 %v486_v21  ;;  %1125 = vmatmul.mubr.f32.gmra.mxu1 %v490_v22 }
 0x112   :  { %1127 = vmatprep.mubr.f32.mxu1 %v491_v23  ;;  %v450_v23 = vadd.f32 %v1079_v50, %v193_v49 }
 0x115   :  { %1128 = vmatmul.mubr.f32.gmra.mxu1 %v492_v24  ;;  %v445_v24 = vadd.f32 %v444_v53, %v188_v44 }
 0x116   :  { %1130 = vmatprep.mubr.f32.mxu1 %v493_v25 }
 0x119   :  { %1131 = vmatmul.mubr.f32.gmra.mxu1 %v494_v26 }
 0x11a   :  { %1133 = vmatprep.mubr.f32.mxu1 %v495_v27 }
 0x11d   :  { %1134 = vmatmul.mubr.f32.gmra.mxu1 %v496_v28 }
 0x11e   :  { %1136 = vmatprep.mubr.f32.mxu1 %v497_v29 }
 0x121   :  { %1137 = vmatmul.mubr.f32.gmra.mxu1 %v498_v30  ;;  %v846_v30 = vsub.s32 3, %v1605_v63 }
 0x122   :  { %1139 = vmatprep.mubr.f32.mxu1 %v499_v31  ;;  %v581_v31 = vpop.permute.xlu0 %580 }
 0x125   :  { %1140 = vmatmul.mubr.f32.gmra.mxu1 %v500_v32  ;;  %v823_v32 = vrot.slane %v36_v3, %v822_v15 }
 0x126   :  { %1142 = vmatprep.mubr.f32.mxu1 %v501_v33 }
 0x129   :  { %1143 = vmatmul.mubr.f32.gmra.mxu1 %v502_v34 }
 0x1cd   :  { %v1117_v60 = vpop.f32.mrf.mxu0  ;;  %v1123_v61 = vpop.f32.mrf.mxu1 }
 0x1ce   :  { %v695_v2 = vadd.f32 %v1117_v60, %v531_v38  ;;  %v715_v20 = vadd.f32 %v1123_v61, %v551_v45  ;;  %v835_v38 = vrot.slane %v36_v3, %v834_v19  ;;  %v455_v60 = vadd.f32 %v454_v58, %v198_v54  ;;  %v601_v58 = vpop.permute.xlu0 %600 }
 0x1cf   :  { %v689_v0 = vpop.f32.mrf.mxu0  ;;  %v709_v1 = vpop.f32.mrf.mxu1 }
 0x1d0   :  { %v690_v4 = vadd.f32 %v689_v0, %v526_v39  ;;  %v789_v14 = vand.u32 2147483647, %v695_v2  ;;  %v710_v21 = vadd.f32 %v709_v1, %v546_v40 }
 0x1d1   :  { %v1120_v5 = vpop.f32.mrf.mxu0  ;;  %v1126_v6 = vpop.f32.mrf.mxu1 }
 0x1d2   :  { %v705_v9 = vadd.f32 %v1120_v5, %v541_v47  ;;  %v788_v16 = vand.u32 2147483647, %v690_v4  ;;  %v813_v27 = vmul.f32 %v811_v13, %v789_v14  ;;  %v725_v28 = vadd.f32 %v1126_v6, %v561_v62 }
 0x1d3   :  { %v699_v10 = vpop.f32.mrf.mxu0  ;;  %v719_v11 = vpop.f32.mrf.mxu1  ;;  %v793_v47 = vand.u32 2147483647, %v715_v20  ;;  %v792_v45 = vand.u32 2147483647, %v710_v21  ;;  %v847_v62 = vrot.slane %v36_v3, %v846_v30 }
 0x1d4   :  { %v700_v17 = vadd.f32 %v699_v10, %v536_v42  ;;  %v791_v25 = vand.u32 2147483647, %v705_v9  ;;  %v812_v33 = vmul.f32 %v811_v13, %v788_v16  ;;  %v203_v42 = vpop.permute.xlu1 %202  ;;  %v720_v50 = vadd.f32 %v719_v11, %v556_v52 }
 0x1d5   :  { %v1129_v18 = vpop.f32.mrf.mxu1  ;;  %v460_v49 = vadd.f32 %v1082_v55, %v203_v42  ;;  %v795_v61 = vand.u32 2147483647, %v725_v28  ;;  %v825_v6 = vmul.f32 %v823_v32, %v793_v47  ;;  %v824_v9 = vmul.f32 %v823_v32, %v792_v45 }
 0x1d6   :  { %v735_v22 = vadd.f32 %v1129_v18, %v571_v56  ;;  %v790_v34 = vand.u32 2147483647, %v700_v17  ;;  %v815_v44 = vmul.f32 %v811_v13, %v791_v25  ;;  %v816_v0 = vadd.f32 %v812_v33, %v445_v24 }
 0x1d7   :  { %v729_v26 = vpop.f32.mrf.mxu1  ;;  %v794_v16 = vand.u32 2147483647, %v720_v50  ;;  %v827_v3 = vmul.f32 %v823_v32, %v795_v61 }
 0x1d8   :  { %v730_v29 = vadd.f32 %v729_v26, %v566_v51  ;;  %v797_v40 = vand.u32 2147483647, %v735_v22  ;;  %v817_v51 = vadd.f32 %v813_v27, %v450_v23  ;;  %v814_v1 = vmul.f32 %v811_v13, %v790_v34 }
 0x1d9   :  { %v1132_v39 = vpop.f32.mrf.mxu1  ;;  %v819_v15 = vadd.f32 %v815_v44, %v460_v49  ;;  %v828_v19 = vadd.f32 %v824_v9, %v816_v0  ;;  %v826_v26 = vmul.f32 %v823_v32, %v794_v16 }
 0x1da   :  { %v745_v56 = vadd.f32 %v1132_v39, %v581_v31  ;;  %v796_v53 = vand.u32 2147483647, %v730_v29  ;;  %v837_v10 = vmul.f32 %v835_v38, %v797_v40  ;;  %v829_v11 = vadd.f32 %v825_v6, %v817_v51 }
 0x1db   :  { %v739_v57 = vpop.f32.mrf.mxu1  ;;  %v818_v20 = vadd.f32 %v814_v1, %v455_v60  ;;  %v611_v60 = vpop.permute.xlu0 %610 }
 0x1dc   :  { %v799_v2 = vand.u32 2147483647, %v745_v56  ;;  %v740_v4 = vadd.f32 %v739_v57, %v576_v59  ;;  %v836_v55 = vmul.f32 %v835_v38, %v796_v53  ;;  %v596_v59 = vpop.permute.xlu1 %595  ;;  %v841_v22 = vadd.f32 %v837_v10, %v829_v11 }
 0x1dd   :  { %v1135_v5 = vpop.f32.mrf.mxu1  ;;  %v830_v34 = vadd.f32 %v826_v26, %v818_v20 }
 0x1de   :  { %v755_v14 = vadd.f32 %v1135_v5, %v591_v7  ;;  %v798_v17 = vand.u32 2147483647, %v740_v4  ;;  %v839_v13 = vmul.f32 %v835_v38, %v799_v2  ;;  %v831_v7 = vadd.f32 %v827_v3, %v819_v15 }
 0x1df   :  { %v749_v52 = vpop.f32.mrf.mxu1  ;;  %v840_v27 = vadd.f32 %v836_v55, %v828_v19  ;;  %v183_v1 = vpop.permute.xlu0 %182  ;;  %v425_v2 = vadd.f32 %v1599_v43, %v1591_v35  ;;  %v430_v5 = vadd.f32 %v1597_v41, %v1595_v37 }
 0x1e0   :  { %v801_v18 = vand.u32 2147483647, %v755_v14  ;;  %v750_v54 = vadd.f32 %v749_v52, %v586_v12  ;;  %v838_v28 = vmul.f32 %v835_v38, %v798_v17  ;;  %v843_v39 = vadd.f32 %v839_v13, %v831_v7  ;;  %v606_v49 = vpop.permute.xlu1 %605 }
 0x1e1   :  { %v1138_v21 = vpop.f32.mrf.mxu1  ;;  %v479_v14 = vmax.f32 %v425_v2, 0.0  ;;  %v480_v17 = vmax.f32 %v430_v5, 0.0  ;;  %v435_v52 = vadd.f32 %v1603_v48, %v1593_v36  ;;  %v440_v35 = vadd.f32 %v1601_v46, %v183_v1 }
 0x1e2   :  { %v849_v23 = vmul.f32 %v847_v62, %v801_v18  ;;  %v800_v24 = vand.u32 2147483647, %v750_v54  ;;  %v765_v25 = vadd.f32 %v1138_v21, %v601_v58  ;;  %v842_v56 = vadd.f32 %v838_v28, %v830_v34 }
 0x1e3   :  { %v759_v29 = vpop.f32.mrf.mxu1  ;;  %v887_v11 = vpop.permute.xlu0 %886 }
 0x1e4   :  { %v853_v30 = vadd.f32 %v849_v23, %v841_v22  ;;  %v848_v31 = vmul.f32 %v847_v62, %v800_v24  ;;  %v803_v33 = vand.u32 2147483647, %v765_v25  ;;  %v760_v12 = vadd.f32 %v759_v29, %v596_v59  ;;  %v616_v61 = vpop.permute.xlu1 %615 }
 0x1e5   :  { %v1141_v57 = vpop.f32.mrf.mxu1  ;;  %v904_v20 = vmul.f32 %v887_v11, %v479_v14  ;;  %v481_v22 = vmax.f32 %v435_v52, 0.0  ;;  %v482_v24 = vmax.f32 %v440_v35, 0.0 }
 0x1e6   :  { %v862_v42 = vmul.f32 1.442695, %v853_v30  ;;  %v852_v47 = vadd.f32 %v848_v31, %v840_v27  ;;  %v851_v45 = vmul.f32 %v847_v62, %v803_v33  ;;  %v802_v40 = vand.u32 2147483647, %v760_v12 }
 0x1e7   :  { %v769_v0 = vpop.f32.mrf.mxu1  ;;  %vm857_vm1 = vcmp.gt.f32.partialorder %v853_v30, 0.0  ;;  %v897_v28 = vpop.permute.xlu0 %896 }
 0x1e8   :  { %1181 = vpow2.f32 %v862_v42  ;;  %v860_v44 = vmul.f32 1.442695, %v852_v47  ;;  %v855_v50 = vadd.f32 %v851_v45, %v843_v39  ;;  %v850_v53 = vmul.f32 %v847_v62, %v802_v40  ;;  %v621_v6 = vpop.permute.xlu1 %620 }
 0x1e9   :  { %v1144_v4 = vpop.f32.mrf.mxu1  ;;  %v775_v62 = vadd.f32 %v1141_v57, %v611_v60  ;;  %v770_v10 = vadd.f32 %v769_v0, %v606_v49  ;;  %vm856_vm2 = vcmp.gt.f32.partialorder %v852_v47, 0.0 }
 0x1ea   :  { %1183 = vpow2.f32 %v860_v44  ;;  %v866_v32 = vmul.f32 1.442695, %v855_v50  ;;  %v854_v38 = vadd.f32 %v850_v53, %v842_v56  ;;  %v785_v58 = vadd.f32 %v1144_v4, %v621_v6 }
 0x1eb   :  { %v779_v16 = vpop.f32.mrf.mxu1  ;;  %v805_v43 = vand.u32 2147483647, %v775_v62  ;;  %v804_v41 = vand.u32 2147483647, %v770_v10  ;;  %vm859_vm3 = vcmp.gt.f32.partialorder %v855_v50, 0.0 }
 0x1ec   :  { %1185 = vpow2.f32 %v866_v32  ;;  %v864_v51 = vmul.f32 1.442695, %v854_v38  ;;  %v780_v19 = vadd.f32 %v779_v16, %v616_v61  ;;  %v892_v3 = vpop.permute.xlu1 %891  ;;  %v807_v26 = vand.u32 2147483647, %v785_v58  ;;  %v925_v32 = vpop.permute.xlu0 %924 }
 0x1ed   :  { %v905_v48 = vmul.f32 %v892_v3, %v480_v17  ;;  %vm858_vm4 = vcmp.gt.f32.partialorder %v854_v38, 0.0 }
 0x1ee   :  { %1187 = vpow2.f32 %v864_v51  ;;  %v806_v27 = vand.u32 2147483647, %v780_v19 }
 0x1f0   :  { %v902_v34 = vpop.permute.xlu1 %901 }
 0x1f1   :  { %v907_v39 = vmul.f32 %v902_v34, %v482_v24 }
 0x1f5   :  { %v1182_v9 = vpop.eup %1181 }
 0x1f6   :  { %v972_v15 = vadd.f32 -1.0, %v1182_v9 }
 0x1f7   :  { %v1184_v55 = vpop.eup %1183 }
 0x1f8   :  { %v873_v18 = vsel %vm857_vm1, %v853_v30, %v972_v15  ;;  %v971_v54 = vadd.f32 -1.0, %v1184_v55  ;;  %v906_v30 = vmul.f32 %v897_v28, %v481_v22 }
 0x1f9   :  { %v1186_v37 = vpop.eup %1185  ;;  %v877_v23 = vmul.f32 %v873_v18, %v805_v43 }
 0x1fa   :  { %v872_v13 = vsel %vm856_vm2, %v852_v47, %v971_v54  ;;  %v974_v21 = vadd.f32 -1.0, %v1186_v37 }
 0x1fb   :  { %v1188_v59 = vpop.eup %1187  ;;  %v876_v36 = vmul.f32 %v872_v13, %v804_v41  ;;  %v909_v31 = vadd.f32 %v905_v48, %v877_v23 }
 0x1fc   :  { %v875_v46 = vsel %vm859_vm3, %v855_v50, %v974_v21  ;;  %v973_v25 = vadd.f32 -1.0, %v1188_v59 }
 0x1fd   :  { %v908_v7 = vadd.f32 %v904_v20, %v876_v36  ;;  %v879_v33 = vmul.f32 %v875_v46, %v807_v26 }
 0x1fe   :  { %v874_v29 = vsel %vm858_vm4, %v854_v38, %v973_v25  ;;  %v930_v38 = vrot.slane %v925_v32, %v810_v8 }
 0x1ff   :  { %v878_v12 = vmul.f32 %v874_v29, %v806_v27  ;;  %v912_v42 = vadd.f32 %v909_v31, %v908_v7  ;;  %v911_v45 = vadd.f32 %v907_v39, %v879_v33 }
 0x201   :  { %v910_v47 = vadd.f32 %v906_v30, %v878_v12 }
 0x203   :  { %v913_v40 = vadd.f32 %v912_v42, %v910_v47 }
 0x205   :  { %v914_v56 = vadd.f32 %v913_v40, %v911_v45 }
 0x207   :  { %v915_v49 = vrot.slane %v914_v56, 4 }
 0x209   :  { %v916_v44 = vadd.f32 %v915_v49, %v914_v56 }
 0x20b   :  { %v917_v50 = vrot.slane %v916_v44, 2 }
 0x20d   :  { %v918_v53 = vadd.f32 %v917_v50, %v916_v44 }
 0x20f   :  { %v919_v57 = vrot.slane %v918_v53, 1 }
 0x211   :  { %v920_v60 = vadd.f32 %v919_v57, %v918_v53 }
 0x213   :  { %v931_v51 = vadd.f32 %v930_v38, %v920_v60 }
 0x215   :  { %932 = vst [vmem:[#allocation3] sm:$0x1] %v931_v51 }
 0x216   :  { %1200 = shalt.err (!%p1197_p4)
}
 0x217   :  { %942 = dma.vmem_to_hbm [thread:$0]  %s940_s22, 16, %s1636_s8, [#allocation4]  }
 0x218   :  { %1209 = dma.done.wait [#allocation4], 16  }
 0x219   :  { %1210 = vsyncadd [#allocation4], 4294967280 }
 0x21a   :  { %946 = vsyncpa [#allocation4], 1 }

</bundles_post_ra>
